<compile_context>
chip_gen: v7x
topology: tpu7x:2x2x1
jax: 0.10.0
libtpu: 0.0.40
codegen_flags: <defaults>
</compile_context>

<pallas_src>
import jax
import jax.numpy as jnp
from jax.experimental import pallas as pl
from jax.experimental.pallas import tpu as pltpu


def boost_kernel(xt_ref, w_ref, o_ref, acc_ref):
    # xt_ref : [tD, tB]  X^T tile   (features on sublanes, batch on lanes)
    # w_ref  : [tD, 1]   weight column tile
    # o_ref  : [1, tB]   lane-dense output tile
    # acc_ref: [tD, tB]  f32 VMEM scratch, resident across the D (reduction) axis
    k = pl.program_id(1)

    @pl.when(k == 0)
    def _init():
        acc_ref[...] = jnp.zeros_like(acc_ref)

    # PosLinear: elementwise x * relu(w), accumulated across D tiles.
    # Pure VPU work in the inner loop (no per-tile XLU reduce).
    w_relu = jnp.maximum(w_ref[...], 0.0)          # [tD, 1], broadcast over lanes
    acc_ref[...] += xt_ref[...] * w_relu           # [tD, tB]

    @pl.when(k == pl.num_programs(1) - 1)
    def _finalize():
        # Single cross-sublane reduce per batch tile, then Hardtanh clamp.
        y = jnp.sum(acc_ref[...], axis=0, keepdims=True)   # [1, tB]
        o_ref[...] = jnp.clip(y, -1.0, 1.0)


def _round_up(x, m):
    return (x + m - 1) // m * m


def boost_model(x, w):
    """x: [B, D] float32, w: [D] float32 -> [B] float32."""
    x = x.astype(jnp.float32)
    w = w.astype(jnp.float32)
    B, D = x.shape

    # --- tile selection ---------------------------------------------------
    # Batch on lanes: tile must be a multiple of 128 (lane width).
    tB = min(512, _round_up(B, 128))
    # Features on sublanes: multiple of 8; single D tile when D is modest.
    tD = _round_up(D, 8) if D <= 1024 else 512
    B_pad = _round_up(B, tB)
    D_pad = _round_up(D, tD)
    nB, nD = B_pad // tB, D_pad // tD

    # --- padding (layout plumbing, done once in the wrapper) ---------------
    # Padded features contribute relu(0)*x = 0; padded batch columns produce
    # clip(0) = 0 and are sliced off below.
    xt = jnp.zeros((D_pad, B_pad), jnp.float32).at[:D, :B].set(x.T)
    wc = jnp.zeros((D_pad, 1), jnp.float32).at[:D, 0].set(w)

    # --- VMEM budget (double-buffered inputs + accumulator + output) -------
    # Weight block pads its lane dim to 128 in VMEM.
    est = 4 * (2 * tD * tB + 2 * tD * 128 + tD * tB + 2 * 8 * tB)
    vmem_limit = int(min(max(2 * est, 8 << 20), 48 << 20))  # safe on v7x (64 MiB)

    out = pl.pallas_call(
        boost_kernel,
        out_shape=jax.ShapeDtypeStruct((1, B_pad), jnp.float32),
        grid_spec=pltpu.PrefetchScalarGridSpec(
            num_scalar_prefetch=0,
            grid=(nB, nD),                       # reduction axis (D) last
            in_specs=[
                pl.BlockSpec((tD, tB), lambda i, k: (k, i)),   # X^T tile
                pl.BlockSpec((tD, 1), lambda i, k: (k, 0)),    # w column (B-invariant)
            ],
            out_specs=pl.BlockSpec((1, tB), lambda i, k: (0, i)),  # lane-dense
            scratch_shapes=[pltpu.VMEM((tD, tB), jnp.float32)],
        ),
        compiler_params=pltpu.CompilerParams(
            dimension_semantics=("parallel", "arbitrary"),
            vmem_limit_bytes=vmem_limit,
        ),
    )(xt, wc)
    return out[0, :B]


if __name__ == "__main__":
    key = jax.random.PRNGKey(0)
    kx, kw = jax.random.split(key)

    batch, in_features = 8, 32

    # torch.rand(dim) + 0.1 -> uniform [0.1, 1.1); deterministic via PRNGKey(0)
    weights = jax.random.uniform(kw, (in_features,), dtype=jnp.float32) + 0.1
    # example input (negative values so the hardtanh clamp is exercised)
    x = jax.random.normal(kx, (batch, in_features), dtype=jnp.float32)

    y = boost_model(x, weights)
    y = jax.block_until_ready(y)

    # reference check in plain JAX
    y_ref = jnp.clip(x @ jnp.maximum(weights, 0.0), -1.0, 1.0)
    assert y.shape == (batch,), y.shape
    assert jnp.allclose(y, y_ref, atol=1e-5), (y, y_ref)

    print("KERNEL_OK")
</pallas_src>

<mosaic_0001>
module attributes {stable_mosaic.version = 11 : i64} {
  func.func @boost_kernel(%arg0: i32, %arg1: i32, %arg2: memref<32x128xf32, #tpu.memory_space<vmem>>, %arg3: memref<32x1xf32, #tpu.memory_space<vmem>>, %arg4: memref<1x128xf32, #tpu.memory_space<vmem>>, %arg5: memref<32x128xf32, #tpu.memory_space<vmem>>) attributes {dimension_semantics = [#tpu.dimension_semantics<parallel>, #tpu.dimension_semantics<arbitrary>], iteration_bounds = array<i64: 1, 1>, scalar_prefetch = 0 : i64, scratch_operands = 1 : i64, tpu.core_type = #tpu.core_type<tc>, window_params = [{transform_indices = @transform_0, window_bounds = array<i64: 32, 128>}, {transform_indices = @transform_1, window_bounds = array<i64: 32, 1>}, {transform_indices = @transform_2, window_bounds = array<i64: 1, 128>}]} {
    %c0_i32 = arith.constant 0 : i32
    %0 = arith.cmpi eq, %arg1, %c0_i32 : i32
    %1 = arith.extui %0 : i1 to i32
    %c0_i32_0 = arith.constant 0 : i32
    %2 = arith.cmpi ne, %1, %c0_i32_0 : i32
    scf.if %2 {
      %cst_10 = arith.constant 0.000000e+00 : f32
      %15 = vector.broadcast %cst_10 : f32 to vector<32x128xf32>
      %c0_11 = arith.constant 0 : index
      %c0_12 = arith.constant 0 : index
      %16 = vector.load %arg5[%c0_11, %c0_12] : memref<32x128xf32, #tpu.memory_space<vmem>>, vector<32x128xf32>
      tpu.vector_store %arg5[%c0_11, %c0_12], %15 {strides = array<i32>} : memref<32x128xf32, #tpu.memory_space<vmem>>, vector<32x128xf32>,
    } else {
    }
    %c0 = arith.constant 0 : index
    %c0_1 = arith.constant 0 : index
    %3 = vector.load %arg3[%c0, %c0_1] : memref<32x1xf32, #tpu.memory_space<vmem>>, vector<32x1xf32>
    %cst = arith.constant 0.000000e+00 : f32
    %4 = vector.broadcast %cst : f32 to vector<32x1xf32>
    %5 = arith.maximumf %3, %4 : vector<32x1xf32>
    %c0_2 = arith.constant 0 : index
    %c0_3 = arith.constant 0 : index
    %6 = vector.load %arg5[%c0_2, %c0_3] : memref<32x128xf32, #tpu.memory_space<vmem>>, vector<32x128xf32>
    %c0_4 = arith.constant 0 : index
    %c0_5 = arith.constant 0 : index
    %7 = vector.load %arg2[%c0_4, %c0_5] : memref<32x128xf32, #tpu.memory_space<vmem>>, vector<32x128xf32>
    %8 = vector.broadcast %5 : vector<32x1xf32> to vector<32x128xf32>
    %9 = arith.mulf %7, %8 : vector<32x128xf32>
    %10 = arith.addf %6, %9 : vector<32x128xf32>
    %c0_6 = arith.constant 0 : index
    %c0_7 = arith.constant 0 : index
    %11 = vector.load %arg5[%c0_6, %c0_7] : memref<32x128xf32, #tpu.memory_space<vmem>>, vector<32x128xf32>
    tpu.vector_store %arg5[%c0_6, %c0_7], %10 {strides = array<i32>} : memref<32x128xf32, #tpu.memory_space<vmem>>, vector<32x128xf32>,
    %c0_i32_8 = arith.constant 0 : i32
    %12 = arith.cmpi eq, %arg1, %c0_i32_8 : i32
    %13 = arith.extui %12 : i1 to i32
    %c0_i32_9 = arith.constant 0 : i32
    %14 = arith.cmpi ne, %13, %c0_i32_9 : i32
    scf.if %14 {
      %c0_10 = arith.constant 0 : index
      %c0_11 = arith.constant 0 : index
      %15 = vector.load %arg5[%c0_10, %c0_11] : memref<32x128xf32, #tpu.memory_space<vmem>>, vector<32x128xf32>
      %cst_12 = arith.constant dense<0.000000e+00> : vector<128xf32>
      %16 = vector.multi_reduction <add>, %15, %cst_12 [0] : vector<32x128xf32> to vector<128xf32>
      %17 = vector.shape_cast %16 : vector<128xf32> to vector<1x128xf32>
      %cst_13 = arith.constant -1.000000e+00 : f32
      %cst_14 = arith.constant 1.000000e+00 : f32
      %18 = vector.broadcast %cst_13 : f32 to vector<1x128xf32>
      %19 = arith.maximumf %18, %17 : vector<1x128xf32>
      %20 = vector.broadcast %cst_14 : f32 to vector<1x128xf32>
      %21 = arith.minimumf %20, %19 : vector<1x128xf32>
      %c0_15 = arith.constant 0 : index
      %c0_16 = arith.constant 0 : index
      %22 = vector.load %arg4[%c0_15, %c0_16] : memref<1x128xf32, #tpu.memory_space<vmem>>, vector<1x128xf32>
      tpu.vector_store %arg4[%c0_15, %c0_16], %21 {strides = array<i32>} : memref<1x128xf32, #tpu.memory_space<vmem>>, vector<1x128xf32>,
    } else {
    }
    return
  }
  func.func @transform_0(%arg0: i32, %arg1: i32) -> (i32, i32) {
    %c0_i32 = arith.constant 0 : i32
    return %arg1, %arg0 : i32, i32
  }
  func.func @transform_1(%arg0: i32, %arg1: i32) -> (i32, i32) {
    %c0_i32 = arith.constant 0 : i32
    %c0_i32_0 = arith.constant 0 : i32
    return %arg1, %c0_i32 : i32, i32
  }
  func.func @transform_2(%arg0: i32, %arg1: i32) -> (i32, i32) {
    %c0_i32 = arith.constant 0 : i32
    %c0_i32_0 = arith.constant 0 : i32
    return %c0_i32, %arg0 : i32, i32
  }
}

</mosaic_0001>

<bundles_post_ra>
// kernel: tpu_custom_call.1
= control target key start
LH: loop header
LB: loop body
LE: loop exit
PB: predicated region body
PF: predicated region fallthrough
CT: control target
= control target key end

     0   :  { %v130_v3 = vmov 0   ;;  %s183_s0 = inlined_call_operand.vmem [shape: f32[32,128], index: 0, kind: input, shape index: {}]   ;;  %s184_s1 = inlined_call_operand.vmem [shape: f32[32,1], index: 1, kind: input, shape index: {}]   ;;  %s185_s2 = inlined_call_operand.hbm [shape: f32[1,128], index: 2, kind: output, shape index: {}]  }
   0x1   :  { %v22_v0 = vld [vmem:[%s184_s1 + $0x10] sm:$0xff]  ;;  %v20_v1 = vld [vmem:[%s184_s1] sm:$0xff]  ;;  %v23_v2 = vld [vmem:[%s184_s1 + $0x18] sm:$0xff]  ;;  %105 = vset.pattern.permute.xlu1 %v130_v3  ;;  %104 = vset.pattern.permute.xlu0 %v130_v3 }
   0x2   :  { %v26_v4 = vmax.f32 %v22_v0, 0.0  ;;  %v24_v5 = vmax.f32 %v20_v1, 0.0  ;;  %v21_v6 = vld [vmem:[%s184_s1 + $0x8] sm:$0xff] }
   0x3   :  { %7 = vsyncpa [#allocation4], 0  ;;  %v27_v7 = vmax.f32 %v23_v2, 0.0  ;;  %v25_v8 = vmax.f32 %v21_v6, 0.0  ;;  %v32_v11 = vld [vmem:[%s183_s0] sm:$0xff]  ;;  %v33_v12 = vld [vmem:[%s183_s0 + $0x8] sm:$0xff] }
   0x4   :  { %48 = vperm.xlu1 %105, %v26_v4   ;;  %38 = vperm.xlu0 %104, %v24_v5   ;;  %v34_v13 = vld [vmem:[%s183_s0 + $0x10] sm:$0xff]  ;;  %v35_v17 = vld [vmem:[%s183_s0 + $0x18] sm:$0xff]  ;;  %s131_s24 = smov [#allocation3]  }
   0x5   :  { %s93_s25 = sshll.u32 %s131_s24, 4  ;;  %s94_s25 = int_to_ptr.vmem [resolvable:$true] %s93_s25 }
   0x6   :  { %s106_s26 = scalar_lea.vmem %s94_s25, 16  ;;  %s110_s0 = scalar_lea.vmem %s94_s25, 32 }
   0x7   :  { %p107_p0 = scmp.ne.s32.totalorder %s94_s25, %s106_s26  ;;  %p111_p1 = scmp.lt.s32.totalorder %s94_s25, %s94_s25 }
   0x8   :  { %53 = vperm.xlu1 %105, %v27_v7   ;;  %43 = vperm.xlu0 %104, %v25_v8   ;;  %p112_p2 = scmp.lt.s32.totalorder %s110_s0, %s106_s26 }
   0xa   :  { %p113_p3 = por %p112_p2, %p111_p1 }
   0xc   :  { %p114_p4 = pnand %p113_p3, %p107_p0 }
  0x83   :  { %v49_v9 = vpop.permute.xlu1 %48  ;;  %v39_v10 = vpop.permute.xlu0 %38 }
  0x84   :  { %v56_v15 = vmul.f32 %v39_v10, %v32_v11  ;;  %v58_v19 = vmul.f32 %v49_v9, %v34_v13 }
  0x87   :  { %v44_v14 = vpop.permute.xlu0 %43  ;;  %v54_v18 = vpop.permute.xlu1 %53 }
  0x88   :  { %v57_v16 = vmul.f32 %v44_v14, %v33_v12  ;;  %v59_v21 = vmul.f32 %v54_v18, %v35_v17 }
  0x8a   :  { %v75_v20 = vadd.f32 %v57_v16, %v56_v15 }
  0x8c   :  { %v76_v22 = vadd.f32 %v75_v20, %v58_v19 }
  0x8e   :  { %v77_v23 = vadd.f32 %v76_v22, %v59_v21 }
  0x90   :  { %v78_v24 = vrot.slane %v77_v23, 4 }
  0x92   :  { %v79_v25 = vadd.f32 %v78_v24, %v77_v23 }
  0x94   :  { %v80_v26 = vrot.slane %v79_v25, 2 }
  0x96   :  { %v81_v27 = vadd.f32 %v80_v26, %v79_v25 }
  0x98   :  { %v82_v28 = vrot.slane %v81_v27, 1 }
  0x9a   :  { %v83_v29 = vadd.f32 %v82_v28, %v81_v27 }
  0x9c   :  { %v101_v30 = vclamps-f32 %v83_v29, 1.0 }
  0x9e   :  { %86 = vst [vmem:[#allocation3] sm:$0x1] %v101_v30 }
  0x9f   :  { %117 = shalt.err (!%p114_p4)
}
  0xa0   :  { %s118_s29 = scalar_lea.hbm %s185_s2, 16 }
  0xa1   :  { %p119_p5 = scmp.ne.s32.totalorder %s185_s2, %s118_s29  ;;  %p122_p6 = scmp.lt.u32.totalorder %s118_s29, %s185_s2 }
  0xa3   :  { %p124_p7 = pnand %p122_p6, %p119_p5 }
  0xa5   :  { %127 = shalt.err (!%p124_p7)
}
  0xa6   :  { %96 = dma.vmem_to_hbm [thread:$0]  %s94_s25, 16, %s185_s2, [#allocation4]  }
  0xa7   :  { %128 = dma.done.wait [#allocation4], 16  }
  0xa8   :  { %129 = vsyncadd [#allocation4], 4294967280 }
  0xa9   :  { %100 = vsyncpa [#allocation4], 1 }

</bundles_post_ra>
